<compile_context>
chip_gen: v7x
topology: tpu7x:2x2x1
jax: 0.10.0
libtpu: 0.0.40
codegen_flags: <defaults>
</compile_context>

<pallas_src>
import functools

import jax
import jax.numpy as jnp
from jax.experimental import pallas as pl
from jax.experimental.pallas import tpu as pltpu

HIDDEN = 64


def _cdiv(a, b):
    return -(-a // b)


def _round_up(x, m):
    return ((x + m - 1) // m) * m


def _k_tiling(num_features, tk):
    """Balanced K tiling: n_k tiles of width TK (multiple of 128), n_k*TK >= F."""
    n_k = max(1, _cdiv(num_features, tk))
    tk_eff = _round_up(_cdiv(num_features, n_k), 128)
    n_k = max(1, _cdiv(num_features, tk_eff))
    return tk_eff, n_k, n_k * tk_eff


def _b_tiling(batch, tb, *, force_two_tiles):
    """Balanced batch tiling (TB multiple of 8, <=7 wasted rows per tile)."""
    n_b = max(1, _cdiv(batch, tb))
    if force_two_tiles and n_b == 1 and batch >= 16:
        n_b = 2          # let v7x's two TensorCores both get a batch tile
    tb_eff = _round_up(_cdiv(batch, n_b), 8)
    n_b = max(1, _cdiv(batch, tb_eff))
    return tb_eff, n_b


def mlp_kernel(x_ref, w1_ref, b1_ref, w2r_ref, b2_ref, out_ref, acc_ref, *,
               num_features, tk, w1_resident):
    # x_ref:   (TB, TK) f32 (streamed, unpadded -> tail tile masked in-kernel)
    # w1_ref:  (F_pad, 64) bf16 resident   OR   (TK, 64) streamed tile
    # b1_ref:  (1, 64) f32   w2r_ref: (1, 64) f32   b2_ref: (1, 1) f32
    # out_ref: (TB, 1) f32   acc_ref: (TB, 64) f32 scratch
    k = pl.program_id(1)

    @pl.when(k == 0)
    def _():
        acc_ref[...] = jnp.zeros_like(acc_ref)

    x = x_ref[...]
    if num_features % tk != 0:
        # x is not zero-padded along K: zero the garbage columns of the tail
        # K tile (limit >= TK on non-tail tiles, so this is a no-op there).
        col = jax.lax.broadcasted_iota(jnp.int32, x.shape, 1)
        x = jnp.where(col < (num_features - k * tk), x, 0.0)
    x = x.astype(w1_ref.dtype)          # VPU cast, hidden under the tile DMA

    if w1_resident:
        start = pl.multiple_of(k * tk, 8)
        w_tile = w1_ref[pl.ds(start, tk), :]   # slice the VMEM-resident weight
    else:
        w_tile = w1_ref[...]

    # Streamed MXU partial product with f32 accumulation.
    acc_ref[...] += jnp.dot(x, w_tile, preferred_element_type=jnp.float32)

    @pl.when(k == pl.num_programs(1) - 1)
    def _():
        # bias + ReLU in f32 on the VPU (only in the finalize step).
        h = jnp.maximum(acc_ref[...] + b1_ref[...], 0.0)
        # N=1 second matmul -> VPU multiply + lane reduction (keeps MXU free).
        o = jnp.sum(h * w2r_ref[...], axis=-1, keepdims=True) + b2_ref[...]
        out_ref[...] = o.astype(out_ref.dtype)


def prepare_params(w1, b1, w2, b2, *, tk=8192, w1_dtype=jnp.bfloat16):
    """One-time parameter prep, hoisted out of the per-forward path.

    Pads w1 (F, 64) along K to the tile multiple, casts it to the streamed
    dtype, and reshapes the small tensors into VMEM-friendly 2-D rows.
    """
    w1 = jnp.asarray(w1, jnp.float32)
    num_features = w1.shape[0]
    _, _, f_pad = _k_tiling(num_features, tk)
    w1_p = jnp.pad(w1, ((0, f_pad - num_features), (0, 0))).astype(w1_dtype)
    b1_r = jnp.asarray(b1, jnp.float32).reshape(1, HIDDEN)
    w2_r = jnp.asarray(w2, jnp.float32).reshape(HIDDEN, 1).T   # (1, 64) row
    b2_r = jnp.asarray(b2, jnp.float32).reshape(1, 1)
    return w1_p, b1_r, w2_r, b2_r


def mlp_forward(x_nchw, w1_p, b1_r, w2_r, b2_r, *, tb=256, tk=8192,
                max_resident_w1_bytes=16 << 20):
    """MultilayerPerceptron forward.

    x_nchw: (B, C, H, W) f32.  (w1_p, b1_r, w2_r, b2_r) from prepare_params
    (same `tk`).  Returns (out (B, 1) f32, probas (B, 2) bool).
    """
    B = x_nchw.shape[0]
    x_flat = x_nchw.reshape(B, -1)       # == torch .view(B, -1); streamed as-is
    F = x_flat.shape[1]

    TK, n_k, F_pad = _k_tiling(F, tk)
    assert w1_p.shape == (F_pad, HIDDEN), (
        "prepare_params and mlp_forward must be called with the same tk")

    w1_itemsize = jnp.dtype(w1_p.dtype).itemsize
    w1_bytes = F_pad * HIDDEN * w1_itemsize
    # Resident w1 avoids re-streaming ~F*64 weights for every batch tile; the
    # factor 2 accounts for Pallas double-buffering the input allocation.
    w1_resident = (2 * w1_bytes) <= (2 * max_resident_w1_bytes)

    TB, n_b = _b_tiling(B, tb, force_two_tiles=w1_resident)

    if w1_resident:
        w1_spec = pl.BlockSpec((F_pad, HIDDEN), lambda i, k: (0, 0))
        w1_vmem = 2 * w1_bytes
    else:
        w1_spec = pl.BlockSpec((TK, HIDDEN), lambda i, k: (k, 0))
        w1_vmem = 2 * TK * HIDDEN * w1_itemsize

    x_itemsize = jnp.dtype(x_flat.dtype).itemsize
    vmem_bytes = int(
        2 * TB * TK * x_itemsize          # x stream, double-buffered
        + w1_vmem                         # w1 (resident or streamed tiles)
        + TB * HIDDEN * 4                 # accumulator scratch
        + 2 * TB * 4                      # output double buffer
        + 2 * (2 * HIDDEN + 1) * 4        # b1 / w2 / b2 residents (x2 buffers)
    ) + (8 << 20)                         # compiler / internal scratch headroom

    kernel = functools.partial(
        mlp_kernel, num_features=F, tk=TK, w1_resident=w1_resident)

    out = pl.pallas_call(
        kernel,
        out_shape=jax.ShapeDtypeStruct((B, 1), jnp.float32),
        grid_spec=pltpu.PrefetchScalarGridSpec(
            num_scalar_prefetch=0,
            grid=(n_b, n_k),                                  # reduction last
            in_specs=[
                pl.BlockSpec((TB, TK), lambda i, k: (i, k)),      # x tile
                w1_spec,                                          # w1
                pl.BlockSpec((1, HIDDEN), lambda i, k: (0, 0)),   # b1 resident
                pl.BlockSpec((1, HIDDEN), lambda i, k: (0, 0)),   # w2 row resident
                pl.BlockSpec((1, 1), lambda i, k: (0, 0)),        # b2 resident
            ],
            out_specs=pl.BlockSpec((TB, 1), lambda i, k: (i, 0)),
            scratch_shapes=[pltpu.VMEM((TB, HIDDEN), jnp.float32)],
        ),
        compiler_params=pltpu.CompilerParams(
            dimension_semantics=("parallel", "arbitrary"),
            vmem_limit_bytes=vmem_bytes,
        ),
    )(x_flat, w1_p, b1_r, w2_r, b2_r)

    # Glue: boolean concat (matches torch.cat((out < 0, out >= 0), 1)).
    probas = jnp.concatenate([out < 0.0, out >= 0.0], axis=1)
    return out, probas


def init_params(key, num_features, hidden=HIDDEN):
    # torch.nn.Linear-style U(-1/sqrt(in), 1/sqrt(in)) init.
    k1, k2, k3, k4 = jax.random.split(key, 4)
    bound1 = 1.0 / jnp.sqrt(jnp.float32(num_features))
    bound2 = 1.0 / jnp.sqrt(jnp.float32(hidden))
    # stored as (in, out) so the kernel does x @ W + b (== torch x @ W.T + b)
    w1 = jax.random.uniform(k1, (num_features, hidden), jnp.float32, -bound1, bound1)
    b1 = jax.random.uniform(k2, (1, hidden), jnp.float32, -bound1, bound1)
    w2 = jax.random.uniform(k3, (hidden, 1), jnp.float32, -bound2, bound2)
    b2 = jax.random.uniform(k4, (1, 1), jnp.float32, -bound2, bound2)
    return w1, b1, w2, b2


if __name__ == "__main__":
    key = jax.random.PRNGKey(0)
    kxa, kxb, kpa, kpb = jax.random.split(key, 4)

    def run_case(x, raw_params, **fwd_kwargs):
        w1, b1, w2, b2 = raw_params
        prepped = prepare_params(w1, b1, w2, b2, tk=fwd_kwargs.get("tk", 8192))
        fwd = jax.jit(functools.partial(mlp_forward, **fwd_kwargs))
        out, probas = fwd(x, *prepped)
        jax.block_until_ready(out)
        jax.block_until_ready(probas)
        return out, probas

    def check(x, raw_params, out, probas):
        w1, b1, w2, b2 = raw_params
        B = x.shape[0]
        assert out.shape == (B, 1) and out.dtype == jnp.float32
        assert probas.shape == (B, 2) and probas.dtype == jnp.bool_
        x_flat = x.reshape(B, -1)
        b1_row = b1.reshape(1, -1)
        # reference with the same bf16 matmul operands as the kernel
        xb = x_flat.astype(jnp.bfloat16).astype(jnp.float32)
        wb = w1.astype(jnp.bfloat16).astype(jnp.float32)
        ref_bf = jnp.maximum(xb @ wb + b1_row, 0.0) @ w2 + b2
        assert jnp.allclose(out, ref_bf, atol=2e-3, rtol=2e-3), (
            f"max abs diff vs bf16 ref: {jnp.max(jnp.abs(out - ref_bf))}")
        # full-f32 torch-style reference (looser tolerance: bf16 weight stream)
        ref_f32 = jnp.maximum(x_flat @ w1 + b1_row, 0.0) @ w2 + b2
        assert jnp.allclose(out, ref_f32, atol=2e-2, rtol=2e-2), (
            f"max abs diff vs f32 ref: {jnp.max(jnp.abs(out - ref_f32))}")
        # probas consistent with out (torch semantics: out==0 -> (False, True))
        assert bool(jnp.all(probas[:, 0] == (out[:, 0] < 0.0)))
        assert bool(jnp.all(probas[:, 1] == (out[:, 0] >= 0.0)))

    # Case A: exact tiling (F = 1024, multiple of 128), resident w1.
    Ba, Ca, Ha, Wa = 2, 4, 16, 16
    xa = jax.random.normal(kxa, (Ba, Ca, Ha, Wa), jnp.float32)
    params_a = init_params(kpa, Ca * Ha * Wa)
    out_a, probas_a = run_case(xa, params_a)
    check(xa, params_a, out_a, probas_a)

    # Case B: ragged shapes (F = 969, B = 6) -> exercises the partial-block /
    # in-kernel K-masking path used for real CelebA feature counts.
    Bb, Cb, Hb, Wb = 6, 3, 17, 19
    xb_in = jax.random.normal(kxb, (Bb, Cb, Hb, Wb), jnp.float32)
    params_b = init_params(kpb, Cb * Hb * Wb)
    out_b, probas_b = run_case(xb_in, params_b)
    check(xb_in, params_b, out_b, probas_b)

    # Case C: force the streamed-w1 fallback path and confirm it matches the
    # resident-w1 result bit-for-bit on the same inputs.
    out_c, probas_c = run_case(xa, params_a, max_resident_w1_bytes=0)
    assert jnp.allclose(out_a, out_c, atol=0.0, rtol=0.0)
    assert bool(jnp.all(probas_a == probas_c))

    print("KERNEL_OK")
</pallas_src>

<mosaic_0001>
module attributes {stable_mosaic.version = 11 : i64} {
  func.func @mlp_kernel(%arg0: i32, %arg1: i32, %arg2: memref<8x1024xf32, #tpu.memory_space<vmem>>, %arg3: memref<1024x64xbf16, #tpu.memory_space<vmem>>, %arg4: memref<1x64xf32, #tpu.memory_space<vmem>>, %arg5: memref<1x64xf32, #tpu.memory_space<vmem>>, %arg6: memref<1x1xf32, #tpu.memory_space<vmem>>, %arg7: memref<8x1xf32, #tpu.memory_space<vmem>>, %arg8: memref<8x64xf32, #tpu.memory_space<vmem>>) attributes {dimension_semantics = [#tpu.dimension_semantics<parallel>, #tpu.dimension_semantics<arbitrary>], iteration_bounds = array<i64: 1, 1>, scalar_prefetch = 0 : i64, scratch_operands = 1 : i64, tpu.core_type = #tpu.core_type<tc>, window_params = [{transform_indices = @transform_0, window_bounds = array<i64: 8, 1024>}, {pipeline_mode = #tpu.pipeline_mode<synchronous>, transform_indices = @transform_1, window_bounds = array<i64: 1024, 64>}, {pipeline_mode = #tpu.pipeline_mode<synchronous>, transform_indices = @transform_2, window_bounds = array<i64: 1, 64>}, {pipeline_mode = #tpu.pipeline_mode<synchronous>, transform_indices = @transform_3, window_bounds = array<i64: 1, 64>}, {pipeline_mode = #tpu.pipeline_mode<synchronous>, transform_indices = @transform_4, window_bounds = array<i64: 1, 1>}, {transform_indices = @transform_5, window_bounds = array<i64: 8, 1>}]} {
    %c0_i32 = arith.constant 0 : i32
    %0 = arith.cmpi eq, %arg1, %c0_i32 : i32
    %1 = arith.extui %0 : i1 to i32
    %c0_i32_0 = arith.constant 0 : i32
    %2 = arith.cmpi ne, %1, %c0_i32_0 : i32
    scf.if %2 {
      %cst_9 = arith.constant 0.000000e+00 : f32
      %16 = vector.broadcast %cst_9 : f32 to vector<8x64xf32>
      %c0_10 = arith.constant 0 : index
      %c0_11 = arith.constant 0 : index
      %17 = vector.load %arg8[%c0_10, %c0_11] : memref<8x64xf32, #tpu.memory_space<vmem>>, vector<8x64xf32>
      tpu.vector_store %arg8[%c0_10, %c0_11], %16 {strides = array<i32>} : memref<8x64xf32, #tpu.memory_space<vmem>>, vector<8x64xf32>,
    } else {
    }
    %c0 = arith.constant 0 : index
    %c0_1 = arith.constant 0 : index
    %3 = vector.load %arg2[%c0, %c0_1] : memref<8x1024xf32, #tpu.memory_space<vmem>>, vector<8x1024xf32>
    %4 = arith.truncf %3 : vector<8x1024xf32> to vector<8x1024xbf16>
    %c1024_i32 = arith.constant 1024 : i32
    %5 = arith.muli %arg1, %c1024_i32 : i32
    %6 = tpu.assume_multiple %5, 8 : i32
    %7 = arith.index_cast %6 : i32 to index
    %c0_2 = arith.constant 0 : index
    %8 = vector.load %arg3[%7, %c0_2] : memref<1024x64xbf16, #tpu.memory_space<vmem>>, vector<1024x64xbf16>
    %c0_3 = arith.constant 0 : index
    %c0_4 = arith.constant 0 : index
    %9 = vector.load %arg8[%c0_3, %c0_4] : memref<8x64xf32, #tpu.memory_space<vmem>>, vector<8x64xf32>
    %cst = arith.constant dense<0.000000e+00> : vector<8x64xf32>
    %10 = tpu.matmul %4, %8, %cst {dimension_numbers = #tpu.dot_dimension_numbers<[1], [0], [0], [1], [0, 0, 1, 1], [], []>} : vector<8x1024xbf16>, vector<1024x64xbf16>, vector<8x64xf32> -> vector<8x64xf32>
    %11 = arith.addf %9, %10 : vector<8x64xf32>
    %c0_5 = arith.constant 0 : index
    %c0_6 = arith.constant 0 : index
    %12 = vector.load %arg8[%c0_5, %c0_6] : memref<8x64xf32, #tpu.memory_space<vmem>>, vector<8x64xf32>
    tpu.vector_store %arg8[%c0_5, %c0_6], %11 {strides = array<i32>} : memref<8x64xf32, #tpu.memory_space<vmem>>, vector<8x64xf32>,
    %c0_i32_7 = arith.constant 0 : i32
    %13 = arith.cmpi eq, %arg1, %c0_i32_7 : i32
    %14 = arith.extui %13 : i1 to i32
    %c0_i32_8 = arith.constant 0 : i32
    %15 = arith.cmpi ne, %14, %c0_i32_8 : i32
    scf.if %15 {
      %c0_9 = arith.constant 0 : index
      %c0_10 = arith.constant 0 : index
      %16 = vector.load %arg8[%c0_9, %c0_10] : memref<8x64xf32, #tpu.memory_space<vmem>>, vector<8x64xf32>
      %c0_11 = arith.constant 0 : index
      %c0_12 = arith.constant 0 : index
      %17 = vector.load %arg4[%c0_11, %c0_12] : memref<1x64xf32, #tpu.memory_space<vmem>>, vector<1x64xf32>
      %18 = vector.broadcast %17 : vector<1x64xf32> to vector<8x64xf32>
      %19 = arith.addf %16, %18 : vector<8x64xf32>
      %cst_13 = arith.constant 0.000000e+00 : f32
      %20 = vector.broadcast %cst_13 : f32 to vector<8x64xf32>
      %21 = arith.maximumf %19, %20 : vector<8x64xf32>
      %c0_14 = arith.constant 0 : index
      %c0_15 = arith.constant 0 : index
      %22 = vector.load %arg5[%c0_14, %c0_15] : memref<1x64xf32, #tpu.memory_space<vmem>>, vector<1x64xf32>
      %23 = vector.broadcast %22 : vector<1x64xf32> to vector<8x64xf32>
      %24 = arith.mulf %21, %23 : vector<8x64xf32>
      %cst_16 = arith.constant dense<0.000000e+00> : vector<8xf32>
      %25 = vector.multi_reduction <add>, %24, %cst_16 [1] : vector<8x64xf32> to vector<8xf32>
      %26 = vector.shape_cast %25 : vector<8xf32> to vector<8x1xf32>
      %c0_17 = arith.constant 0 : index
      %c0_18 = arith.constant 0 : index
      %27 = vector.load %arg6[%c0_17, %c0_18] : memref<1x1xf32, #tpu.memory_space<vmem>>, vector<1x1xf32>
      %28 = vector.broadcast %27 : vector<1x1xf32> to vector<8x1xf32>
      %29 = arith.addf %26, %28 : vector<8x1xf32>
      %c0_19 = arith.constant 0 : index
      %c0_20 = arith.constant 0 : index
      %30 = vector.load %arg7[%c0_19, %c0_20] : memref<8x1xf32, #tpu.memory_space<vmem>>, vector<8x1xf32>
      tpu.vector_store %arg7[%c0_19, %c0_20], %29 {strides = array<i32>} : memref<8x1xf32, #tpu.memory_space<vmem>>, vector<8x1xf32>,
    } else {
    }
    return
  }
  func.func @transform_0(%arg0: i32, %arg1: i32) -> (i32, i32) {
    %c0_i32 = arith.constant 0 : i32
    return %arg0, %arg1 : i32, i32
  }
  func.func @transform_1(%arg0: i32, %arg1: i32) -> (i32, i32) {
    %c0_i32 = arith.constant 0 : i32
    %c0_i32_0 = arith.constant 0 : i32
    %c0_i32_1 = arith.constant 0 : i32
    return %c0_i32, %c0_i32_0 : i32, i32
  }
  func.func @transform_2(%arg0: i32, %arg1: i32) -> (i32, i32) {
    %c0_i32 = arith.constant 0 : i32
    %c0_i32_0 = arith.constant 0 : i32
    %c0_i32_1 = arith.constant 0 : i32
    return %c0_i32, %c0_i32_0 : i32, i32
  }
  func.func @transform_3(%arg0: i32, %arg1: i32) -> (i32, i32) {
    %c0_i32 = arith.constant 0 : i32
    %c0_i32_0 = arith.constant 0 : i32
    %c0_i32_1 = arith.constant 0 : i32
    return %c0_i32, %c0_i32_0 : i32, i32
  }
  func.func @transform_4(%arg0: i32, %arg1: i32) -> (i32, i32) {
    %c0_i32 = arith.constant 0 : i32
    %c0_i32_0 = arith.constant 0 : i32
    %c0_i32_1 = arith.constant 0 : i32
    return %c0_i32, %c0_i32_0 : i32, i32
  }
  func.func @transform_5(%arg0: i32, %arg1: i32) -> (i32, i32) {
    %c0_i32 = arith.constant 0 : i32
    %c0_i32_0 = arith.constant 0 : i32
    return %arg0, %c0_i32 : i32, i32
  }
}

</mosaic_0001>

<bundles_post_ra>
// kernel: mlp_forward.1
= control target key start
LH: loop header
LB: loop body
LE: loop exit
PB: predicated region body
PF: predicated region fallthrough
CT: control target
= control target key end

     0   :  { %s1395_s0 = inlined_call_operand.vmem [shape: f32[2,1024], index: 0, kind: input, shape index: {}]   ;;  %s1396_s1 = inlined_call_operand.vmem [shape: bf16[1024,64], index: 1, kind: input, shape index: {}]   ;;  %s1397_s2 = inlined_call_operand.vmem [shape: f32[1,64], index: 2, kind: input, shape index: {}]   ;;  %s1398_s3 = inlined_call_operand.vmem [shape: f32[1,64], index: 3, kind: input, shape index: {}]   ;;  %s1399_s4 = inlined_call_operand.<no memory space> [shape: f32[1,1], index: 4, kind: input, shape index: {}]   ;;  %s1400_s5 = inlined_call_operand.vmem [shape: f32[2,1], index: 5, kind: output, shape index: {}]  }
   0x1   :  { %v10_v0 = vstv %s1399_s4 }
   0x2   :  { %11 = vst [vmem:[#allocation3] sm:$0x1] %v10_v0 }
   0x3   :  { %v1046_v1 = vld [vmem:[%s1396_s1 + $0x40] sm:$0xff]   ;;  %v1050_v5 = vld [vmem:[%s1396_s1 + $0x48] sm:$0xff]   ;;  %v1054_v9 = vld [vmem:[%s1396_s1 + $0x50] sm:$0xff]   ;;  %v52_v31 = vlaneseq  ;;  %v1122_v36 = vmov 1983009808   ;;  %vm27_vm0 = vcmask 523264  }
   0x4   :  { %v1047_v2 = vld [vmem:[%s1396_s1 + $0xc0] sm:$0xff]   ;;  %956 = vmatprep.subr.bf16.mxu0 %v1046_v1  ;;  %v1051_v6 = vld [vmem:[%s1396_s1 + $0xc8] sm:$0xff]   ;;  %v1055_v10 = vld [vmem:[%s1396_s1 + $0xd0] sm:$0xff]   ;;  %v50_v37 = vunpack.c.l.s4 %v1122_v36  ;;  %vm846_vm1 = vcmask 7168  }
   0x5   :  { %v1048_v3 = vld [vmem:[%s1396_s1] sm:$0xff]   ;;  %978 = vmatprep.subr.bf16.mxu1 %v1047_v2  ;;  %v1052_v7 = vld [vmem:[%s1396_s1 + $0x8] sm:$0xff]   ;;  %v1056_v11 = vld [vmem:[%s1396_s1 + $0x10] sm:$0xff]   ;;  %v53_v38 = vshrl.u32 %v52_v31, 7 }
   0x6   :  { %v1049_v4 = vld [vmem:[%s1396_s1 + $0x80] sm:$0xff]   ;;  %957 = vmatpush3.bf16.msra.mxu0 %v1048_v3  ;;  %v1053_v8 = vld [vmem:[%s1396_s1 + $0x88] sm:$0xff]   ;;  %v1057_v12 = vld [vmem:[%s1396_s1 + $0x90] sm:$0xff]   ;;  %v51_v41 = vunpack.c.0.s8 %v50_v37 }
   0x7   :  { %979 = vmatpush3.bf16.msra.mxu1 %v1049_v4  ;;  %958 = vmatprep.subr.bf16.mxu0 %v1050_v5  ;;  %v1058_v13 = vld [vmem:[%s1396_s1 + $0x58] sm:$0xff]   ;;  %v1062_v17 = vld [vmem:[%s1396_s1 + $0x60] sm:$0xff]   ;;  %v1066_v21 = vld [vmem:[%s1396_s1 + $0x68] sm:$0xff]  }
   0x8   :  { %980 = vmatprep.subr.bf16.mxu1 %v1051_v6  ;;  %v1059_v14 = vld [vmem:[%s1396_s1 + $0xd8] sm:$0xff]   ;;  %v1063_v18 = vld [vmem:[%s1396_s1 + $0xe0] sm:$0xff]   ;;  %v1067_v22 = vld [vmem:[%s1396_s1 + $0xe8] sm:$0xff]   ;;  %v1271_v44 = vsub.s32 %v51_v41, %v53_v38 }
   0x9   :  { %v1060_v15 = vld [vmem:[%s1396_s1 + $0x18] sm:$0xff]   ;;  %v1064_v19 = vld [vmem:[%s1396_s1 + $0x20] sm:$0xff]   ;;  %v1068_v23 = vld [vmem:[%s1396_s1 + $0x28] sm:$0xff]  }
   0xa   :  { %959 = vmatpush3.bf16.msra.mxu0 %v1052_v7  ;;  %v1061_v16 = vld [vmem:[%s1396_s1 + $0x98] sm:$0xff]   ;;  %v1065_v20 = vld [vmem:[%s1396_s1 + $0xa0] sm:$0xff]   ;;  %v1069_v24 = vld [vmem:[%s1396_s1 + $0xa8] sm:$0xff]  }
   0xb   :  { %981 = vmatpush3.bf16.msra.mxu1 %v1053_v8  ;;  %960 = vmatprep.subr.bf16.mxu0 %v1054_v9  ;;  %v1070_v25 = vld [vmem:[%s1396_s1 + $0x70] sm:$0xff]   ;;  %v1074_v29 = vld [vmem:[%s1396_s1 + $0x78] sm:$0xff]   ;;  %v1084_v42 = vld [vmem:[%s1396_s1 + $0x140] sm:$0xff]  }
   0xc   :  { %982 = vmatprep.subr.bf16.mxu1 %v1055_v10  ;;  %v1071_v26 = vld [vmem:[%s1396_s1 + $0xf0] sm:$0xff]   ;;  %v1075_v30 = vld [vmem:[%s1396_s1 + $0xf8] sm:$0xff]   ;;  %v1085_v43 = vld [vmem:[%s1396_s1 + $0x1c0] sm:$0xff]  }
   0xd   :  { %v1072_v27 = vld [vmem:[%s1396_s1 + $0x30] sm:$0xff]   ;;  %v1076_v32 = vld [vmem:[%s1396_s1 + $0x38] sm:$0xff]   ;;  %v1086_v53 = vld [vmem:[%s1396_s1 + $0x100] sm:$0xff]  }
   0xe   :  { %961 = vmatpush3.bf16.msra.mxu0 %v1056_v11  ;;  %v1073_v28 = vld [vmem:[%s1396_s1 + $0xb0] sm:$0xff]   ;;  %v1077_v33 = vld [vmem:[%s1396_s1 + $0xb8] sm:$0xff]   ;;  %v1087_v54 = vld [vmem:[%s1396_s1 + $0x180] sm:$0xff]  }
   0xf   :  { %983 = vmatpush3.bf16.msra.mxu1 %v1057_v12  ;;  %962 = vmatprep.subr.bf16.mxu0 %v1058_v13  ;;  %v1078_v34 = vld [vmem:[%s1395_s0] ss:$16 sps:$4 sm:$0xff]   ;;  %v1082_v39 = vld [vmem:[%s1395_s0 + $0x4] ss:$16 sps:$4 sm:$0xff]   ;;  %v1088_v59 = vld [vmem:[%s1396_s1 + $0x148] sm:$0xff]  }
  0x10   :  { %984 = vmatprep.subr.bf16.mxu1 %v1059_v14  ;;  %v1080_v35 = vld [vmem:[%s1395_s0 + $0x20] ss:$16 sps:$4 sm:$0xff]   ;;  %v1083_v40 = vld [vmem:[%s1395_s0 + $0x24] ss:$16 sps:$4 sm:$0xff]   ;;  %v55_v45 = vrot.slane %v1078_v34, %v1271_v44  ;;  %v62_v47 = vrot.slane %v1082_v39, %v1271_v44  ;;  %v1089_v60 = vld [vmem:[%s1396_s1 + $0x1c8] sm:$0xff]   ;;  %v1123_v39 = vmov 0.0  }
  0x11   :  { %v69_v46 = vrot.slane %v1080_v35, %v1271_v44  ;;  %v76_v48 = vrot.slane %v1083_v40, %v1271_v44  ;;  %v1090_v61 = vld [vmem:[%s1396_s1 + $0x108] sm:$0xff]   ;;  %v1092_v63 = vld [vmem:[%s1396_s1 + $0x150] sm:$0xff]   ;;  %v1096_v3 = vld [vmem:[%s1396_s1 + $0x158] sm:$0xff]   ;;  %28 = vst.msk [vmem:[#allocation2] sm:$0xff] %vm27_vm0, %v1123_v39 }
  0x12   :  { %963 = vmatpush3.bf16.msra.mxu0 %v1060_v15  ;;  %v1091_v62 = vld [vmem:[%s1396_s1 + $0x188] sm:$0xff]   ;;  %v1093_v0 = vld [vmem:[%s1396_s1 + $0x1d0] sm:$0xff]   ;;  %v1097_v4 = vld [vmem:[%s1396_s1 + $0x1d8] sm:$0xff]  }
  0x13   :  { %985 = vmatpush3.bf16.msra.mxu1 %v1061_v16  ;;  %964 = vmatprep.subr.bf16.mxu0 %v1062_v17  ;;  %v78_v49 = vcombine.high %v55_v45, %v69_v46  ;;  %v80_v50 = vcombine.high %v62_v47, %v76_v48  ;;  %v77_v51 = vcombine.low %v55_v45, %v69_v46  ;;  %v1094_v1 = vld [vmem:[%s1396_s1 + $0x110] sm:$0xff]   ;;  %v1098_v5 = vld [vmem:[%s1396_s1 + $0x118] sm:$0xff]   ;;  %v1100_v7 = vld [vmem:[%s1396_s1 + $0x160] sm:$0xff]  }
  0x14   :  { %986 = vmatprep.subr.bf16.mxu1 %v1063_v18  ;;  %v79_v52 = vcombine.low %v62_v47, %v76_v48  ;;  %v1095_v2 = vld [vmem:[%s1396_s1 + $0x190] sm:$0xff]   ;;  %v1099_v6 = vld [vmem:[%s1396_s1 + $0x198] sm:$0xff]   ;;  %v1101_v8 = vld [vmem:[%s1396_s1 + $0x1e0] sm:$0xff]  }
  0x15   :  { %v126_v55 = vpack.c.bf16 %v78_v49, %v78_v49  ;;  %v128_v56 = vpack.c.bf16 %v80_v50, %v80_v50  ;;  %v125_v57 = vpack.c.bf16 %v77_v51, %v77_v51  ;;  %v1102_v9 = vld [vmem:[%s1396_s1 + $0x120] sm:$0xff]   ;;  %v1104_v11 = vld [vmem:[%s1396_s1 + $0x168] sm:$0xff]   ;;  %v1108_v15 = vld [vmem:[%s1396_s1 + $0x170] sm:$0xff]  }
  0x16   :  { %965 = vmatpush3.bf16.msra.mxu0 %v1064_v19  ;;  %v127_v58 = vpack.c.bf16 %v79_v52, %v79_v52  ;;  %v1103_v10 = vld [vmem:[%s1396_s1 + $0x1a0] sm:$0xff]   ;;  %v1105_v12 = vld [vmem:[%s1396_s1 + $0x1e8] sm:$0xff]   ;;  %v1109_v16 = vld [vmem:[%s1396_s1 + $0x1f0] sm:$0xff]  }
  0x17   :  { %987 = vmatpush3.bf16.msra.mxu1 %v1065_v20  ;;  %966 = vmatprep.subr.bf16.mxu0 %v1066_v21  ;;  %v1106_v13 = vld [vmem:[%s1396_s1 + $0x128] sm:$0xff]   ;;  %v1110_v17 = vld [vmem:[%s1396_s1 + $0x130] sm:$0xff]   ;;  %v1112_v19 = vld [vmem:[%s1396_s1 + $0x178] sm:$0xff]  }
  0x18   :  { %988 = vmatprep.subr.bf16.mxu1 %v1067_v22  ;;  %683 = vmatprep.mubr.bf16.mxu0 %v126_v55  ;;  %v1107_v14 = vld [vmem:[%s1396_s1 + $0x1a8] sm:$0xff]   ;;  %v1111_v18 = vld [vmem:[%s1396_s1 + $0x1b0] sm:$0xff]   ;;  %v1113_v20 = vld [vmem:[%s1396_s1 + $0x1f8] sm:$0xff]  }
  0x19   :  { %723 = vmatprep.mubr.bf16.mxu1 %v128_v56  ;;  %v1116_v21 = vld [vmem:[%s1395_s0 + $0x8] ss:$16 sps:$4 sm:$0xff]  }
  0x1a   :  { %967 = vmatpush3.bf16.msra.mxu0 %v1068_v23  ;;  %v1118_v22 = vld [vmem:[%s1395_s0 + $0x28] ss:$16 sps:$4 sm:$0xff]   ;;  %v1120_v23 = vld [vmem:[%s1395_s0 + $0xc] ss:$16 sps:$4 sm:$0xff]  }
  0x1b   :  { %989 = vmatpush3.bf16.msra.mxu1 %v1069_v24  ;;  %968 = vmatprep.subr.bf16.mxu0 %v1070_v25  ;;  %v1121_v24 = vld [vmem:[%s1395_s0 + $0x2c] ss:$16 sps:$4 sm:$0xff]   ;;  %v91_v25 = vrot.slane %v1116_v21, %v1271_v44 }
  0x1c   :  { %990 = vmatprep.subr.bf16.mxu1 %v1071_v26  ;;  %v105_v26 = vrot.slane %v1118_v22, %v1271_v44 }
  0x1e   :  { %969 = vmatpush3.bf16.msra.mxu0 %v1072_v27  ;;  %v98_v27 = vrot.slane %v1120_v23, %v1271_v44  ;;  %v114_v31 = vcombine.high %v91_v25, %v105_v26 }
  0x1f   :  { %991 = vmatpush3.bf16.msra.mxu1 %v1073_v28  ;;  %970 = vmatprep.subr.bf16.mxu0 %v1074_v29  ;;  %v1114_v28 = vld [vmem:[%s1396_s1 + $0x138] sm:$0xff]  }
  0x20   :  { %992 = vmatprep.subr.bf16.mxu1 %v1075_v30  ;;  %v1115_v29 = vld [vmem:[%s1396_s1 + $0x1b8] sm:$0xff]   ;;  %v112_v30 = vrot.slane %v1121_v24, %v1271_v44  ;;  %v130_v35 = vpack.c.bf16 %v114_v31, %v114_v31 }
  0x22   :  { %971 = vmatpush3.bf16.msra.mxu0 %v1076_v32  ;;  %v113_v32 = vcombine.low %v91_v25, %v105_v26  ;;  %v115_v34 = vcombine.low %v98_v27, %v112_v30 }
  0x23   :  { %993 = vmatpush3.bf16.msra.mxu1 %v1077_v33  ;;  %1000 = vmatprep.subr.bf16.mxu0 %v1084_v42  ;;  %v116_v33 = vcombine.high %v98_v27, %v112_v30 }
  0x24   :  { %1022 = vmatprep.subr.bf16.mxu1 %v1085_v43  ;;  %v129_v36 = vpack.c.bf16 %v113_v32, %v113_v32  ;;  %v131_v38 = vpack.c.bf16 %v115_v34, %v115_v34 }
  0x25   :  { %684 = vmatmul.mubr.bf16.vlgmr.msra.gmra.mrb[0].mxu0 %v125_v57  ;;  %v132_v37 = vpack.c.bf16 %v116_v33, %v116_v33 }
  0x26   :  { %724 = vmatmul.mubr.bf16.vlgmr.msra.gmra.mrb[0].mxu1 %v127_v58  ;;  %1001 = vmatpush3.bf16.msra.mxu0 %v1086_v53 }
  0x27   :  { %1023 = vmatpush3.bf16.msra.mxu1 %v1087_v54  ;;  %1002 = vmatprep.subr.bf16.mxu0 %v1088_v59 }
  0x28   :  { %1024 = vmatprep.subr.bf16.mxu1 %v1089_v60  ;;  %763 = vmatprep.mubr.bf16.mxu0 %v130_v35 }
  0x29   :  { %803 = vmatprep.mubr.bf16.mxu1 %v132_v37 }
  0x2a   :  { %1003 = vmatpush3.bf16.msra.mxu0 %v1090_v61 }
  0x2b   :  { %1025 = vmatpush3.bf16.msra.mxu1 %v1091_v62  ;;  %1004 = vmatprep.subr.bf16.mxu0 %v1092_v63  ;;  %v266_v62 = vld [vmem:[#allocation2] sm:$0xff] }
  0x2c   :  { %1026 = vmatprep.subr.bf16.mxu1 %v1093_v0 }
  0x2e   :  { %1005 = vmatpush3.bf16.msra.mxu0 %v1094_v1  ;;  %v953_v1 = vld [vmem:[%s1397_s2] ss:$0 sm:$0xff] }
  0x2f   :  { %1027 = vmatpush3.bf16.msra.mxu1 %v1095_v2  ;;  %1006 = vmatprep.subr.bf16.mxu0 %v1096_v3 }
  0x30   :  { %1028 = vmatprep.subr.bf16.mxu1 %v1097_v4  ;;  %v954_v4 = vld [vmem:[%s1398_s3] ss:$0 sm:$0xff] }
  0x32   :  { %1007 = vmatpush3.bf16.msra.mxu0 %v1098_v5 }
  0x33   :  { %1029 = vmatpush3.bf16.msra.mxu1 %v1099_v6  ;;  %1008 = vmatprep.subr.bf16.mxu0 %v1100_v7 }
  0x34   :  { %1030 = vmatprep.subr.bf16.mxu1 %v1101_v8  ;;  %v955_v8 = vld [vmem:[#allocation3] ss:$0 sm:$0xff] }
  0x36   :  { %1009 = vmatpush3.bf16.msra.mxu0 %v1102_v9 }
  0x37   :  { %1031 = vmatpush3.bf16.msra.mxu1 %v1103_v10  ;;  %1010 = vmatprep.subr.bf16.mxu0 %v1104_v11 }
  0x38   :  { %1032 = vmatprep.subr.bf16.mxu1 %v1105_v12 }
  0x3a   :  { %1011 = vmatpush3.bf16.msra.mxu0 %v1106_v13 }
  0x3b   :  { %1033 = vmatpush3.bf16.msra.mxu1 %v1107_v14  ;;  %1012 = vmatprep.subr.bf16.mxu0 %v1108_v15 }
  0x3c   :  { %1034 = vmatprep.subr.bf16.mxu1 %v1109_v16 }
  0x3e   :  { %1013 = vmatpush3.bf16.msra.mxu0 %v1110_v17 }
  0x3f   :  { %1035 = vmatpush3.bf16.msra.mxu1 %v1111_v18  ;;  %1014 = vmatprep.subr.bf16.mxu0 %v1112_v19 }
  0x40   :  { %1036 = vmatprep.subr.bf16.mxu1 %v1113_v20 }
  0x42   :  { %1015 = vmatpush3.bf16.msra.mxu0 %v1114_v28 }
  0x43   :  { %1037 = vmatpush3.bf16.msra.mxu1 %v1115_v29 }
  0x45   :  { %764 = vmatmul.mubr.bf16.vlgmr.msra.gmra.mrb[4].mxu0 %v129_v36 }
  0x46   :  { %804 = vmatmul.mubr.bf16.vlgmr.msra.gmra.mrb[4].mxu1 %v131_v38 }
  0xf8   :  { %v972_v40 = vpop.f32.mrb[0].mxu0 }
  0xf9   :  { %v994_v41 = vpop.f32.mrb[0].mxu1  ;;  %v973_v42 = vpop.f32.mrb[1].mxu0 }
  0xfa   :  { %v995_v43 = vpop.f32.mrb[1].mxu1  ;;  %v974_v44 = vadd.f32 %v973_v42, %v972_v40  ;;  %v975_v46 = vpop.f32.mrb[2].mxu0 }
  0xfb   :  { %v996_v45 = vadd.f32 %v995_v43, %v994_v41  ;;  %v997_v47 = vpop.f32.mrb[2].mxu1  ;;  %v976_v48 = vpop.f32.mrb[3].mxu0 }
  0xfc   :  { %v998_v49 = vpop.f32.mrb[3].mxu1 }
  0xfd   :  { %v726_v50 = vadd.f32 %v996_v45, %v974_v44 }
 0x118   :  { %v1016_v51 = vpop.f32.mrb[4].mxu0 }
 0x119   :  { %v1038_v52 = vpop.f32.mrb[4].mxu1  ;;  %v1017_v53 = vpop.f32.mrb[5].mxu0 }
 0x11a   :  { %v1039_v54 = vpop.f32.mrb[5].mxu1  ;;  %v1018_v55 = vadd.f32 %v1017_v53, %v1016_v51  ;;  %v1019_v57 = vpop.f32.mrb[6].mxu0 }
 0x11b   :  { %v1040_v56 = vadd.f32 %v1039_v54, %v1038_v52  ;;  %v1041_v58 = vpop.f32.mrb[6].mxu1  ;;  %v1020_v59 = vpop.f32.mrb[7].mxu0 }
 0x11c   :  { %v1042_v60 = vpop.f32.mrb[7].mxu1  ;;  %v766_v61 = vadd.f32 %v1018_v55, %v726_v50 }
 0x11e   :  { %v806_v63 = vadd.f32 %v1040_v56, %v766_v61 }
 0x120   :  { %v811_v0 = vadd.f32 %v806_v63, %v266_v62 }
 0x122   :  { %813 = vst.msk [vmem:[#allocation2] sm:$0xff] %vm27_vm0, %v811_v0 }
 0x129   :  { %v817_v2 = vld [vmem:[#allocation2] sm:$0xff] }
 0x12a   :  { %v825_v3 = vadd.f32 %v953_v1, %v817_v2 }
 0x12c   :  { %v826_v5 = vmax.f32 %v825_v3, 0.0 }
 0x12e   :  { %v834_v6 = vmul.f32 %v954_v4, %v826_v5 }
 0x130   :  { %v835_v7 = vsel %vm27_vm0, %v834_v6, 0.0 }
 0x131   :  { %836 = vadd.xlane.f32.xlu0 %v835_v7 }
 0x1be   :  { %v837_v9 = vpop.xlane.xlu0 %836 }
 0x1bf   :  { %v845_v10 = vadd.f32 %v955_v8, %v837_v9 }
 0x1c1   :  { %847 = vst.msk [vmem:[#allocation4] sm:$0xff] %vm846_vm1, %v845_v10 }
 0x1c8   :  { %v865_v11 = vld [vmem:[#allocation4] sm:$0x3] }
 0x1c9   :  { %866 = vst [vmem:[%s1400_s5] sm:$0x3] %v865_v11 }

</bundles_post_ra>
